<compile_context>
chip_gen: v6e
topology: v6e:2x2x1
jax: 0.10.0
libtpu: 0.0.40
codegen_flags: <defaults>
</compile_context>

<pallas_src>
from functools import partial

import jax
import jax.numpy as jnp
from jax import lax
from jax.experimental import pallas as pl
from jax.experimental.pallas import tpu as pltpu


def _round_up(n, m):
    return ((n + m - 1) // m) * m


def _choose_tiling(batch, target_tile):
    """Pick a lane-dense (multiple-of-128) batch tile and padded batch size."""
    target_tile = max(128, _round_up(target_tile, 128))
    b128 = max(128, _round_up(batch, 128))
    if b128 <= target_tile:
        tb, b_pad = b128, b128
    else:
        tb = target_tile
        b_pad = _round_up(batch, tb)
    # Prefer >= 2 grid steps so "parallel" can split tiles across v7x's two TensorCores.
    if b_pad // tb == 1 and tb % 256 == 0:
        tb //= 2
    return b_pad, tb, b_pad // tb


def _maybe_vmem_limit(tile_bytes, weight_bytes):
    # x^T + out^T tiles, each double-buffered, plus resident weights.
    vmem_est = 4 * tile_bytes + 2 * weight_bytes
    if vmem_est > 12 * 1024 * 1024:  # only override the scoped default when we actually need it
        return {"vmem_limit_bytes": int(min(2 * vmem_est, 64 * 1024 * 1024))}
    return {}


# ---------------------------------------------------------------------------
# Lane-dense single forward pass (batch on the 128-lane axis):
#   h^T   = tanh(W1 @ x^T + b1)     W1: (H, D_in), x^T: (D_in, TB) -> (H, TB)
#   out^T = W2 @ h^T + b2           W2: (D_in, H)                  -> (D_in, TB)
# ---------------------------------------------------------------------------
def grnode_kernel(xT_ref, w1_ref, b1_ref, w2_ref, b2_ref, oT_ref):
    x = xT_ref[...].astype(jnp.float32)                                       # (D_in, TB)
    h = jnp.tanh(
        jnp.dot(w1_ref[...], x, preferred_element_type=jnp.float32) + b1_ref[...]
    )                                                                          # (H, TB)
    out = jnp.dot(w2_ref[...], h, preferred_element_type=jnp.float32) + b2_ref[...]
    oT_ref[...] = out.astype(oT_ref.dtype)                                     # (D_in, TB)


def grnode_forward(t, x, w1, b1, w2, b2, *, batch_tile=4096, stream_dtype=None):
    """Pallas GRNODE.forward(t, x). `t` is unused (matches PyTorch).

    x: (B, D_in); weights in nn.Linear layout: w1 (H, D_in), b1 (H, 1), w2 (D_in, H), b2 (D_in, 1).
    If stream_dtype is given (e.g. jnp.bfloat16), x/out are streamed in that dtype; compute stays f32.
    """
    del t
    B, D_in = x.shape
    H = w1.shape[0]
    assert w1.shape == (H, D_in) and w2.shape == (D_in, H)
    assert b1.shape == (H, 1) and b2.shape == (D_in, 1)

    b_pad, TB, n_tiles = _choose_tiling(B, batch_tile)
    stream = jnp.dtype(stream_dtype) if stream_dtype is not None else jnp.dtype(x.dtype)

    xT = x.T
    if b_pad != B:
        xT = jnp.pad(xT, ((0, 0), (0, b_pad - B)))
    if xT.dtype != stream:
        xT = xT.astype(stream)

    tile_bytes = D_in * TB * stream.itemsize
    weight_bytes = (w1.size + w2.size + b1.size + b2.size) * 4
    cp_kwargs = _maybe_vmem_limit(tile_bytes, weight_bytes)

    outT = pl.pallas_call(
        grnode_kernel,
        out_shape=jax.ShapeDtypeStruct((D_in, b_pad), stream),
        grid=(n_tiles,),
        in_specs=[
            pl.BlockSpec((D_in, TB), lambda i: (0, i)),   # x^T: lane-dense batch tiles
            pl.BlockSpec((H, D_in), lambda i: (0, 0)),    # W1: resident
            pl.BlockSpec((H, 1), lambda i: (0, 0)),       # b1: resident
            pl.BlockSpec((D_in, H), lambda i: (0, 0)),    # W2: resident
            pl.BlockSpec((D_in, 1), lambda i: (0, 0)),    # b2: resident
        ],
        out_specs=pl.BlockSpec((D_in, TB), lambda i: (0, i)),
        compiler_params=pltpu.CompilerParams(
            dimension_semantics=("parallel",), **cp_kwargs),
    )(xT, w1, b1, w2, b2)

    return outT[:, :B].T


# ---------------------------------------------------------------------------
# Fused multi-evaluation kernel: `num_steps` explicit-Euler steps of
#   x_{n+1} = x_n + dt * net(x_n)
# in ONE pallas_call; weights resident, bias broadcasts hoisted, loop unrolled.
# ---------------------------------------------------------------------------
def grnode_euler_kernel(xT_ref, w1_ref, b1_ref, w2_ref, b2_ref, oT_ref, *, num_steps, dt):
    D_in, TB = xT_ref.shape
    w1 = w1_ref[...]                                  # (H, D_in)
    w2 = w2_ref[...]                                  # (D_in, H)
    H = w1.shape[0]
    # Hoist bias broadcasts out of the loop (JAX does not CSE broadcast_in_dim).
    b1 = jnp.broadcast_to(b1_ref[...], (H, TB))
    b2 = jnp.broadcast_to(b2_ref[...], (D_in, TB))

    def body(_, xc):
        h = jnp.tanh(jnp.dot(w1, xc, preferred_element_type=jnp.float32) + b1)
        f = jnp.dot(w2, h, preferred_element_type=jnp.float32) + b2
        return xc + dt * f

    x_final = lax.fori_loop(0, num_steps, body,
                            xT_ref[...].astype(jnp.float32), unroll=True)
    oT_ref[...] = x_final.astype(oT_ref.dtype)


def grnode_euler(x, w1, b1, w2, b2, *, num_steps, dt, batch_tile=4096, stream_dtype=None):
    """Integrate num_steps Euler steps of dx/dt = net(x) in a single kernel launch."""
    B, D_in = x.shape
    H = w1.shape[0]
    b_pad, TB, n_tiles = _choose_tiling(B, batch_tile)
    stream = jnp.dtype(stream_dtype) if stream_dtype is not None else jnp.dtype(x.dtype)

    xT = x.T
    if b_pad != B:
        xT = jnp.pad(xT, ((0, 0), (0, b_pad - B)))
    if xT.dtype != stream:
        xT = xT.astype(stream)

    tile_bytes = D_in * TB * 4  # f32 state kept live in the kernel
    weight_bytes = (w1.size + w2.size + b1.size + b2.size) * 4
    cp_kwargs = _maybe_vmem_limit(tile_bytes, weight_bytes)

    outT = pl.pallas_call(
        partial(grnode_euler_kernel, num_steps=num_steps, dt=dt),
        out_shape=jax.ShapeDtypeStruct((D_in, b_pad), stream),
        grid=(n_tiles,),
        in_specs=[
            pl.BlockSpec((D_in, TB), lambda i: (0, i)),
            pl.BlockSpec((H, D_in), lambda i: (0, 0)),
            pl.BlockSpec((H, 1), lambda i: (0, 0)),
            pl.BlockSpec((D_in, H), lambda i: (0, 0)),
            pl.BlockSpec((D_in, 1), lambda i: (0, 0)),
        ],
        out_specs=pl.BlockSpec((D_in, TB), lambda i: (0, i)),
        compiler_params=pltpu.CompilerParams(
            dimension_semantics=("parallel",), **cp_kwargs),
    )(xT, w1, b1, w2, b2)

    return outT[:, :B].T


# ---------------------------------------------------------------------------
# Parameter init mimicking nn.Linear's default U(-1/sqrt(fan_in), 1/sqrt(fan_in)),
# stored in nn.Linear layout: weight (out_features, in_features), bias as a column.
# ---------------------------------------------------------------------------
def init_params(key, input_dim, hidden_dim, dtype=jnp.float32):
    k1, k2, k3, k4 = jax.random.split(key, 4)
    bound1 = 1.0 / (input_dim ** 0.5)
    bound2 = 1.0 / (hidden_dim ** 0.5)
    w1 = jax.random.uniform(k1, (hidden_dim, input_dim), dtype, -bound1, bound1)
    b1 = jax.random.uniform(k2, (hidden_dim, 1), dtype, -bound1, bound1)
    w2 = jax.random.uniform(k3, (input_dim, hidden_dim), dtype, -bound2, bound2)
    b2 = jax.random.uniform(k4, (input_dim, 1), dtype, -bound2, bound2)
    return w1, b1, w2, b2


if __name__ == "__main__":
    input_dim, hidden_dim, batch = 32, 64, 8

    key = jax.random.PRNGKey(0)
    kx, kp, kb = jax.random.split(key, 3)
    x = jax.random.normal(kx, (batch, input_dim), jnp.float32)
    t = jnp.float32(0.0)  # unused, as in the PyTorch forward
    w1, b1, w2, b2 = init_params(kp, input_dim, hidden_dim)

    def net_ref(xv):  # pure-JAX reference in PyTorch orientation
        return jnp.tanh(xv @ w1.T + b1.T) @ w2.T + b2.T

    # --- 1) single forward pass (matches GRNODE.forward semantics) ------------
    out = jax.block_until_ready(grnode_forward(t, x, w1, b1, w2, b2))
    assert out.shape == (batch, input_dim)
    assert jnp.allclose(out, net_ref(x), atol=1e-5, rtol=1e-5)

    # --- 2) non-divisible big batch: padding + multi-tile "parallel" grid ------
    big_batch = 1000
    xb = jax.random.normal(kb, (big_batch, input_dim), jnp.float32)
    out_b = jax.block_until_ready(grnode_forward(t, xb, w1, b1, w2, b2, batch_tile=256))
    assert out_b.shape == (big_batch, input_dim)
    assert jnp.allclose(out_b, net_ref(xb), atol=1e-5, rtol=1e-5)

    # --- 3) bf16 streaming of x/out, f32 compute --------------------------------
    out_bf = jax.block_until_ready(
        grnode_forward(t, xb, w1, b1, w2, b2, batch_tile=256, stream_dtype=jnp.bfloat16))
    assert out_bf.dtype == jnp.bfloat16
    assert jnp.allclose(out_bf.astype(jnp.float32), net_ref(xb), atol=5e-2, rtol=5e-2)

    # --- 4) fused multi-evaluation (Euler) kernel --------------------------------
    num_steps, dt = 8, 0.05
    out_e = jax.block_until_ready(
        grnode_euler(x, w1, b1, w2, b2, num_steps=num_steps, dt=dt))

    def euler_ref(x0):
        def body(_, xc):
            return xc + dt * net_ref(xc)
        return lax.fori_loop(0, num_steps, body, x0)

    assert out_e.shape == (batch, input_dim)
    assert jnp.allclose(out_e, euler_ref(x), atol=1e-4, rtol=1e-4)

    print("KERNEL_OK")
</pallas_src>

<mosaic_0001>
module attributes {stable_mosaic.version = 11 : i64} {
  func.func @grnode_kernel(%arg0: i32, %arg1: memref<32x128xf32, #tpu.memory_space<vmem>>, %arg2: memref<64x32xf32, #tpu.memory_space<vmem>>, %arg3: memref<64x1xf32, #tpu.memory_space<vmem>>, %arg4: memref<32x64xf32, #tpu.memory_space<vmem>>, %arg5: memref<32x1xf32, #tpu.memory_space<vmem>>, %arg6: memref<32x128xf32, #tpu.memory_space<vmem>>) attributes {dimension_semantics = [#tpu.dimension_semantics<parallel>], iteration_bounds = array<i64: 1>, scalar_prefetch = 0 : i64, scratch_operands = 0 : i64, tpu.core_type = #tpu.core_type<tc>, window_params = [{transform_indices = @transform_0, window_bounds = array<i64: 32, 128>}, {pipeline_mode = #tpu.pipeline_mode<synchronous>, transform_indices = @transform_1, window_bounds = array<i64: 64, 32>}, {pipeline_mode = #tpu.pipeline_mode<synchronous>, transform_indices = @transform_2, window_bounds = array<i64: 64, 1>}, {pipeline_mode = #tpu.pipeline_mode<synchronous>, transform_indices = @transform_3, window_bounds = array<i64: 32, 64>}, {pipeline_mode = #tpu.pipeline_mode<synchronous>, transform_indices = @transform_4, window_bounds = array<i64: 32, 1>}, {transform_indices = @transform_5, window_bounds = array<i64: 32, 128>}]} {
    %c0 = arith.constant 0 : index
    %c0_0 = arith.constant 0 : index
    %0 = vector.load %arg1[%c0, %c0_0] : memref<32x128xf32, #tpu.memory_space<vmem>>, vector<32x128xf32>
    %c0_1 = arith.constant 0 : index
    %c0_2 = arith.constant 0 : index
    %1 = vector.load %arg2[%c0_1, %c0_2] : memref<64x32xf32, #tpu.memory_space<vmem>>, vector<64x32xf32>
    %cst = arith.constant dense<0.000000e+00> : vector<64x128xf32>
    %2 = tpu.matmul %1, %0, %cst {dimension_numbers = #tpu.dot_dimension_numbers<[1], [0], [0], [1], [0, 0, 1, 1], [], []>} : vector<64x32xf32>, vector<32x128xf32>, vector<64x128xf32> -> vector<64x128xf32>
    %c0_3 = arith.constant 0 : index
    %c0_4 = arith.constant 0 : index
    %3 = vector.load %arg3[%c0_3, %c0_4] : memref<64x1xf32, #tpu.memory_space<vmem>>, vector<64x1xf32>
    %4 = vector.broadcast %3 : vector<64x1xf32> to vector<64x128xf32>
    %5 = arith.addf %2, %4 : vector<64x128xf32>
    %6 = math.tanh %5 : vector<64x128xf32>
    %c0_5 = arith.constant 0 : index
    %c0_6 = arith.constant 0 : index
    %7 = vector.load %arg4[%c0_5, %c0_6] : memref<32x64xf32, #tpu.memory_space<vmem>>, vector<32x64xf32>
    %cst_7 = arith.constant dense<0.000000e+00> : vector<32x128xf32>
    %8 = tpu.matmul %7, %6, %cst_7 {dimension_numbers = #tpu.dot_dimension_numbers<[1], [0], [0], [1], [0, 0, 1, 1], [], []>} : vector<32x64xf32>, vector<64x128xf32>, vector<32x128xf32> -> vector<32x128xf32>
    %c0_8 = arith.constant 0 : index
    %c0_9 = arith.constant 0 : index
    %9 = vector.load %arg5[%c0_8, %c0_9] : memref<32x1xf32, #tpu.memory_space<vmem>>, vector<32x1xf32>
    %10 = vector.broadcast %9 : vector<32x1xf32> to vector<32x128xf32>
    %11 = arith.addf %8, %10 : vector<32x128xf32>
    %c0_10 = arith.constant 0 : index
    %c0_11 = arith.constant 0 : index
    %12 = vector.load %arg6[%c0_10, %c0_11] : memref<32x128xf32, #tpu.memory_space<vmem>>, vector<32x128xf32>
    tpu.vector_store %arg6[%c0_10, %c0_11], %11 {strides = array<i32>} : memref<32x128xf32, #tpu.memory_space<vmem>>, vector<32x128xf32>,
    return
  }
  func.func @transform_0(%arg0: i32) -> (i32, i32) {
    %c0_i32 = arith.constant 0 : i32
    %c0_i32_0 = arith.constant 0 : i32
    return %c0_i32, %arg0 : i32, i32
  }
  func.func @transform_1(%arg0: i32) -> (i32, i32) {
    %c0_i32 = arith.constant 0 : i32
    %c0_i32_0 = arith.constant 0 : i32
    %c0_i32_1 = arith.constant 0 : i32
    return %c0_i32, %c0_i32_0 : i32, i32
  }
  func.func @transform_2(%arg0: i32) -> (i32, i32) {
    %c0_i32 = arith.constant 0 : i32
    %c0_i32_0 = arith.constant 0 : i32
    %c0_i32_1 = arith.constant 0 : i32
    return %c0_i32, %c0_i32_0 : i32, i32
  }
  func.func @transform_3(%arg0: i32) -> (i32, i32) {
    %c0_i32 = arith.constant 0 : i32
    %c0_i32_0 = arith.constant 0 : i32
    %c0_i32_1 = arith.constant 0 : i32
    return %c0_i32, %c0_i32_0 : i32, i32
  }
  func.func @transform_4(%arg0: i32) -> (i32, i32) {
    %c0_i32 = arith.constant 0 : i32
    %c0_i32_0 = arith.constant 0 : i32
    %c0_i32_1 = arith.constant 0 : i32
    return %c0_i32, %c0_i32_0 : i32, i32
  }
  func.func @transform_5(%arg0: i32) -> (i32, i32) {
    %c0_i32 = arith.constant 0 : i32
    %c0_i32_0 = arith.constant 0 : i32
    return %c0_i32, %arg0 : i32, i32
  }
}

</mosaic_0001>

<bundles_post_ra>
// kernel: tpu_custom_call.1
= control target key start
LH: loop header
LB: loop body
LE: loop exit
PB: predicated region body
PF: predicated region fallthrough
CT: control target
= control target key end

     0   :  { %vm81_vm0 = vcmask 261120   ;;  %v487_v3 = vmov 0   ;;  %s620_s0 = inlined_call_operand.vmem [shape: f32[32,128], index: 0, kind: input, shape index: {}]   ;;  %s621_s1 = inlined_call_operand.vmem [shape: f32[64,32], index: 1, kind: input, shape index: {}]   ;;  %s622_s2 = inlined_call_operand.vmem [shape: f32[64,1], index: 2, kind: input, shape index: {}]   ;;  %s623_s3 = inlined_call_operand.vmem [shape: f32[32,64], index: 3, kind: input, shape index: {}]   ;;  %s624_s4 = inlined_call_operand.vmem [shape: f32[32,1], index: 4, kind: input, shape index: {}]   ;;  %s625_s5 = inlined_call_operand.hbm [shape: f32[32,128], index: 5, kind: output, shape index: {}]  }
   0x1   :  { %v24_v0 = vld [vmem:[%s620_s0 + $0x18] sm:$0xff]  ;;  %v23_v1 = vld [vmem:[%s620_s0 + $0x10] sm:$0xff]  ;;  %v25_v2 = vld [vmem:[%s621_s1] sm:$0xff]  ;;  %447 = vset.pattern.permute.xlu0 %v487_v3  ;;  %448 = vset.pattern.permute.xlu1 %v487_v3 }
   0x2   :  { %401 = vmatprep.subr.mxu0 %v24_v0  ;;  %v22_v4 = vld [vmem:[%s620_s0 + $0x8] sm:$0xff]  ;;  %409 = vmatprep.mubr.msk.f32.mxu0 %vm81_vm0, %v25_v2  ;;  %v21_v5 = vld [vmem:[%s620_s0] sm:$0xff]  ;;  %v40_v6 = vld [vmem:[%s622_s2 + $0x38] sm:$0xff] }
   0x3   :  { %402 = vmatpush3.msra.mxu0 %v24_v0  ;;  %v38_v7 = vld [vmem:[%s622_s2 + $0x28] sm:$0xff]  ;;  %78 = vperm.xlu0 %447, %v40_v6   ;;  %v39_v9 = vld [vmem:[%s622_s2 + $0x30] sm:$0xff]  ;;  %v37_v11 = vld [vmem:[%s622_s2 + $0x20] sm:$0xff] }
   0x4   :  { %403 = vmatprep.subr.mxu0 %v23_v1  ;;  %v26_v8 = vld [vmem:[%s621_s1 + $0x8] sm:$0xff]  ;;  %68 = vperm.xlu1 %448, %v38_v7   ;;  %v27_v10 = vld [vmem:[%s621_s1 + $0x10] sm:$0xff] }
   0x5   :  { %404 = vmatpush3.msra.mxu0 %v23_v1 }
   0x6   :  { %405 = vmatprep.subr.mxu0 %v22_v4 }
   0x7   :  { %406 = vmatpush3.msra.mxu0 %v22_v4 }
   0x8   :  { %407 = vmatprep.subr.mxu0 %v21_v5 }
   0x9   :  { %408 = vmatpush3.msra.mxu0 %v21_v5 }
   0xa   :  { %10 = vsyncpa [#allocation3], 0  ;;  %410 = vmatmul.mubr.msk.f32.vlgmr.msra.gmra.mxu0 %vm81_vm0, %v26_v8  ;;  %73 = vperm.xlu0 %447, %v39_v9   ;;  %v28_v12 = vld [vmem:[%s621_s1 + $0x18] sm:$0xff]  ;;  %v29_v14 = vld [vmem:[%s621_s1 + $0x20] sm:$0xff]  ;;  %vm247_vm1 = vcmask 523264   ;;  %s488_s19 = smov [#allocation2]  }
   0xb   :  { %412 = vmatprep.mubr.msk.f32.mxu0 %vm81_vm0, %v27_v10  ;;  %63 = vperm.xlu1 %448, %v37_v11   ;;  %v36_v13 = vld [vmem:[%s622_s2 + $0x18] sm:$0xff]  ;;  %v35_v15 = vld [vmem:[%s622_s2 + $0x10] sm:$0xff]  ;;  %v30_v16 = vld [vmem:[%s621_s1 + $0x28] sm:$0xff]  ;;  %s354_s20 = sshll.u32 %s488_s19, 4  ;;  %s355_s20 = int_to_ptr.vmem [resolvable:$true] %s354_s20 }
   0xc   :  { %v34_v17 = vld [vmem:[%s622_s2 + $0x8] sm:$0xff]  ;;  %v31_v18 = vld [vmem:[%s621_s1 + $0x30] sm:$0xff]  ;;  %v33_v19 = vld [vmem:[%s622_s2] sm:$0xff]  ;;  %p470_p1 = scmp.lt.s32.totalorder %s355_s20, %s355_s20 }
   0xd   :  { %v32_v20 = vld [vmem:[%s621_s1 + $0x38] sm:$0xff]  ;;  %v223_v21 = vld [vmem:[%s624_s4] sm:$0xff]  ;;  %v224_v22 = vld [vmem:[%s624_s4 + $0x8] sm:$0xff] }
   0xe   :  { %413 = vmatmul.mubr.msk.f32.gmra.mxu0 %vm81_vm0, %v28_v12  ;;  %58 = vperm.xlu0 %447, %v36_v13   ;;  %v225_v23 = vld [vmem:[%s624_s4 + $0x10] sm:$0xff]  ;;  %v226_v24 = vld [vmem:[%s624_s4 + $0x18] sm:$0xff]  ;;  %v219_v25 = vld [vmem:[%s623_s3] sm:$0xff] }
   0xf   :  { %415 = vmatprep.mubr.msk.f32.mxu0 %vm81_vm0, %v29_v14  ;;  %53 = vperm.xlu1 %448, %v35_v15   ;;  %v220_v58 = vld [vmem:[%s623_s3 + $0x8] sm:$0xff]  ;;  %v221_v59 = vld [vmem:[%s623_s3 + $0x10] sm:$0xff]  ;;  %v222_v60 = vld [vmem:[%s623_s3 + $0x18] sm:$0xff]  ;;  %s465_s3 = scalar_lea.vmem %s355_s20, 512 }
  0x10   :  { %437 = vmatprep.mubr.msk.f32.mxu1 %vm247_vm1, %v219_v25  ;;  %p466_p0 = scmp.ne.s32.totalorder %s355_s20, %s465_s3  ;;  %p471_p2 = scmp.lt.s32.totalorder %s465_s3, %s465_s3 }
  0x12   :  { %416 = vmatmul.mubr.msk.f32.gmra.mxu0 %vm81_vm0, %v30_v16  ;;  %48 = vperm.xlu0 %447, %v34_v17   ;;  %p472_p3 = por %p471_p2, %p470_p1 }
  0x13   :  { %418 = vmatprep.mubr.msk.f32.mxu0 %vm81_vm0, %v31_v18  ;;  %43 = vperm.xlu1 %448, %v33_v19  }
  0x14   :  { %p473_p4 = pnand %p472_p3, %p466_p0 }
  0x16   :  { %419 = vmatmul.mubr.msk.f32.gmra.mxu0 %vm81_vm0, %v32_v20  ;;  %229 = vperm.xlu0 %447, %v223_v21  }
  0x17   :  { %234 = vperm.xlu1 %448, %v224_v22  }
  0x1a   :  { %239 = vperm.xlu0 %447, %v225_v23  }
  0x1b   :  { %244 = vperm.xlu1 %448, %v226_v24  }
  0x7e   :  { %v79_v27 = vpop.permute.xlu0 %78 }
  0x7f   :  { %v69_v29 = vpop.permute.xlu1 %68 }
  0x85   :  { %v74_v32 = vpop.permute.xlu0 %73 }
  0x86   :  { %v64_v34 = vpop.permute.xlu1 %63 }
  0x89   :  { %v59_v38 = vpop.permute.xlu0 %58 }
  0x8a   :  { %v54_v42 = vpop.permute.xlu1 %53 }
  0x8d   :  { %v49_v45 = vpop.permute.xlu0 %48 }
  0x8e   :  { %v44_v47 = vpop.permute.xlu1 %43 }
  0x91   :  { %v230_v62 = vpop.permute.xlu0 %229 }
  0x92   :  { %v235_v61 = vpop.permute.xlu1 %234 }
  0x95   :  { %v240_v6 = vpop.permute.xlu0 %239 }
  0x96   :  { %v245_v3 = vpop.permute.xlu1 %244 }
  0xca   :  { %v411_v26 = vpop.f32.mrf.mxu0 }
  0xcb   :  { %v178_v48 = vadd.f32 %v411_v26, %v49_v45 }
  0xcc   :  { %v172_v28 = vpop.f32.mrf.mxu0 }
  0xcd   :  { %v173_v49 = vadd.f32 %v172_v28, %v44_v47 }
  0xce   :  { %v414_v30 = vpop.f32.mrf.mxu0 }
  0xcf   :  { %v188_v44 = vadd.f32 %v414_v30, %v59_v38 }
  0xd0   :  { %v182_v31 = vpop.f32.mrf.mxu0 }
  0xd1   :  { %v183_v46 = vadd.f32 %v182_v31, %v54_v42 }
  0xd2   :  { %v417_v33 = vpop.f32.mrf.mxu0 }
  0xd3   :  { %v198_v40 = vadd.f32 %v417_v33, %v69_v29 }
  0xd4   :  { %v192_v35 = vpop.f32.mrf.mxu0 }
  0xd5   :  { %v193_v43 = vadd.f32 %v192_v35, %v64_v34 }
  0xd6   :  { %v420_v36 = vpop.f32.mrf.mxu0 }
  0xd7   :  { %v208_v37 = vadd.f32 %v420_v36, %v79_v27 }
  0xd8   :  { %v202_v39 = vpop.f32.mrf.mxu0 }
  0xd9   :  { %449 = vtanh.f32 %v208_v37  ;;  %v203_v41 = vadd.f32 %v202_v39, %v74_v32 }
  0xdb   :  { %451 = vtanh.f32 %v203_v41 }
  0xdc   :  { %453 = vtanh.f32 %v198_v40 }
  0xdd   :  { %455 = vtanh.f32 %v193_v43 }
  0xde   :  { %457 = vtanh.f32 %v188_v44 }
  0xdf   :  { %459 = vtanh.f32 %v183_v46 }
  0xe0   :  { %461 = vtanh.f32 %v178_v48 }
  0xe1   :  { %463 = vtanh.f32 %v173_v49 }
  0xe6   :  { %v450_v50 = vpop.eup %449 }
  0xe7   :  { %421 = vmatprep.subr.mxu1 %v450_v50 }
  0xe8   :  { %v452_v51 = vpop.eup %451  ;;  %422 = vmatpush3.msra.mxu1 %v450_v50 }
  0xe9   :  { %423 = vmatprep.subr.mxu1 %v452_v51  ;;  %v454_v52 = vpop.eup %453 }
  0xea   :  { %424 = vmatpush3.msra.mxu1 %v452_v51  ;;  %v456_v53 = vpop.eup %455 }
  0xeb   :  { %425 = vmatprep.subr.mxu1 %v454_v52  ;;  %v458_v54 = vpop.eup %457 }
  0xec   :  { %426 = vmatpush3.msra.mxu1 %v454_v52  ;;  %v460_v55 = vpop.eup %459 }
  0xed   :  { %427 = vmatprep.subr.mxu1 %v456_v53  ;;  %v462_v56 = vpop.eup %461 }
  0xee   :  { %428 = vmatpush3.msra.mxu1 %v456_v53  ;;  %v464_v57 = vpop.eup %463 }
  0xef   :  { %429 = vmatprep.subr.mxu1 %v458_v54 }
  0xf0   :  { %430 = vmatpush3.msra.mxu1 %v458_v54 }
  0xf1   :  { %431 = vmatprep.subr.mxu1 %v460_v55 }
  0xf2   :  { %432 = vmatpush3.msra.mxu1 %v460_v55 }
  0xf3   :  { %433 = vmatprep.subr.mxu1 %v462_v56 }
  0xf4   :  { %434 = vmatpush3.msra.mxu1 %v462_v56 }
  0xf5   :  { %435 = vmatprep.subr.mxu1 %v464_v57 }
  0xf6   :  { %436 = vmatpush3.msra.mxu1 %v464_v57 }
  0xf7   :  { %438 = vmatmul.mubr.msk.f32.vlgmr.msra.gmra.mxu1 %vm247_vm1, %v220_v58 }
  0xf8   :  { %440 = vmatprep.mubr.msk.f32.mxu1 %vm247_vm1, %v221_v59 }
  0xfb   :  { %441 = vmatmul.mubr.msk.f32.gmra.mxu1 %vm247_vm1, %v222_v60 }
 0x1b7   :  { %v439_v63 = vpop.f32.mrf.mxu1 }
 0x1b8   :  { %v332_v0 = vadd.f32 %v439_v63, %v235_v61 }
 0x1b9   :  { %v326_v1 = vpop.f32.mrf.mxu1 }
 0x1ba   :  { %346 = vst [vmem:[#allocation2 + $0x8] sm:$0xff] %v332_v0  ;;  %v327_v2 = vadd.f32 %v326_v1, %v230_v62 }
 0x1bb   :  { %v442_v4 = vpop.f32.mrf.mxu1 }
 0x1bc   :  { %345 = vst [vmem:[#allocation2] sm:$0xff] %v327_v2  ;;  %v342_v5 = vadd.f32 %v442_v4, %v245_v3 }
 0x1bd   :  { %v336_v7 = vpop.f32.mrf.mxu1 }
 0x1be   :  { %348 = vst [vmem:[#allocation2 + $0x18] sm:$0xff] %v342_v5  ;;  %v337_v8 = vadd.f32 %v336_v7, %v240_v6 }
 0x1c0   :  { %347 = vst [vmem:[#allocation2 + $0x10] sm:$0xff] %v337_v8 }
 0x1c1   :  { %476 = shalt.err (!%p473_p4)
}
 0x1c2   :  { %s489_s21 = smov 128   ;;  %s490_s22 = smov 8  }
 0x1c3   :  { %360 = dma.vmem_to_hbm [thread:$0]  %s355_s20, 512, %s625_s5, [#allocation3], %s489_s21, %s489_s21, %s490_s22  }
 0x1c4   :  { %485 = dma.done.wait [#allocation3], 512  }
 0x1c5   :  { %486 = vsyncadd [#allocation3], 4294966784 }
 0x1c6   :  { %364 = vsyncpa [#allocation3], 1 }

</bundles_post_ra>
